<compile_context>
chip_gen: v5e
topology: v5e:2x2
jax: 0.10.0
libtpu: 0.0.40
codegen_flags: <defaults>
</compile_context>

<pallas_src>
import functools

import jax
import jax.numpy as jnp
from jax import lax
from jax.experimental import pallas as pl
from jax.experimental.pallas import tpu as pltpu


def _round_up(x, m):
    return ((x + m - 1) // m) * m


def _ce_kernel_single_chunk(logits_ref, tgt_ref, out_ref):
    """Whole vocab fits in one lane block. Grid = (superblock, row_tile, 1).

    logits_ref : (TN, V) native dtype
    tgt_ref    : (TN, 1) int32, -1 => invalid / padded row
    out_ref    : (1, 8, 128) f32 per-superblock partial sum (accumulated in place)
    """
    i = pl.program_id(1)

    @pl.when(i == 0)
    def _():
        out_ref[...] = jnp.zeros_like(out_ref)

    chunk = logits_ref[...]                                   # (TN, V) native dtype
    tgt = tgt_ref[...]                                        # (TN, 1) int32

    # target gather on the native-dtype tile: lane-iota compare + masked sum (<=1 hit per row,
    # so the reduction is exact even in bf16); only the (TN,1) result is cast to f32.
    col = lax.broadcasted_iota(jnp.int32, chunk.shape, 1)
    tgt_logit = jnp.sum(jnp.where(col == tgt, chunk, jnp.zeros((), chunk.dtype)),
                        axis=-1, keepdims=True).astype(jnp.float32)

    # stable logsumexp: max in native dtype (exact), exp / sum in f32 (promotion in the subtract).
    row_max = jnp.max(chunk, axis=-1, keepdims=True).astype(jnp.float32)
    lse = row_max + jnp.log(jnp.sum(jnp.exp(chunk - row_max), axis=-1, keepdims=True))

    # select (not multiply): garbage/NaN logits in rows past N must not leak through.
    per_tok = jnp.where(tgt >= 0, lse - tgt_logit, 0.0)
    out_ref[...] += jnp.sum(per_tok)


def _make_ce_kernel_chunked(tile_v, v_total, needs_v_mask):
    """V blocked across grid axis 2 with an online logsumexp; state in VMEM scratch columns."""

    def kernel(logits_ref, tgt_ref, out_ref, m_ref, l_ref, tl_ref):
        i = pl.program_id(1)          # row tile within superblock
        j = pl.program_id(2)          # vocab chunk

        @pl.when(jnp.logical_and(i == 0, j == 0))
        def _():
            out_ref[...] = jnp.zeros_like(out_ref)

        @pl.when(j == 0)
        def _():
            m_ref[...] = jnp.full_like(m_ref, -jnp.inf)
            l_ref[...] = jnp.zeros_like(l_ref)
            tl_ref[...] = jnp.zeros_like(tl_ref)

        chunk = logits_ref[...]                               # (TN, TV) native dtype
        tgt = tgt_ref[...]                                    # (TN, 1)  int32

        col = lax.broadcasted_iota(jnp.int32, chunk.shape, 1) + j * tile_v
        if needs_v_mask:  # static: only emitted when V % tile_v != 0 (ragged last vocab block)
            chunk = jnp.where(col < v_total, chunk, jnp.asarray(-jnp.inf, chunk.dtype))

        # fused target gather in native dtype (exact)
        tl_ref[...] += jnp.sum(jnp.where(col == tgt, chunk, jnp.zeros((), chunk.dtype)),
                               axis=-1, keepdims=True).astype(jnp.float32)

        # online logsumexp: f32 running (m, l); chunk max in native dtype (exact)
        c_max = jnp.max(chunk, axis=-1, keepdims=True).astype(jnp.float32)
        m_prev = m_ref[...]
        m_new = jnp.maximum(m_prev, c_max)
        p_sum = jnp.sum(jnp.exp(chunk - m_new), axis=-1, keepdims=True)       # f32
        l_ref[...] = l_ref[...] * jnp.exp(m_prev - m_new) + p_sum
        m_ref[...] = m_new

        @pl.when(j == pl.num_programs(2) - 1)
        def _():
            lse = m_ref[...] + jnp.log(l_ref[...])
            per_tok = jnp.where(tgt >= 0, lse - tl_ref[...], 0.0)   # select, not multiply
            out_ref[...] += jnp.sum(per_tok)

    return kernel


def packed_cross_entropy_loss(predictions, targets, lengths, *, tile_n=512, tile_v=None):
    """predictions: (B, T, V); targets: (B, T) int; lengths: (B,) int -> scalar float32."""
    B, T, V = predictions.shape
    N = B * T
    itemsize = jnp.dtype(predictions.dtype).itemsize

    # ---- vocab (lane) chunking ---------------------------------------------
    if tile_v is None:
        tv = V if V <= 8192 else 2048
    elif tile_v >= V:
        tv = V
    else:
        tv = max(128, (int(tile_v) // 128) * 128)       # chunks must be lane-aligned
    v_tiles = -(-V // tv)
    needs_v_mask = (V % tv) != 0

    # ---- row (token) tiling -------------------------------------------------
    # Budget covers: double-buffered native-dtype logits blocks + ~3 f32 chunk-sized in-body
    # temporaries + lane-padded (TN,1) columns. 28 MiB keeps headroom on v7x (64 MiB / TC).
    SUB = 16                                             # covers f32(8) and bf16(16) packing
    BUDGET = 28 * 1024 * 1024
    bytes_per_row = tv * (2 * itemsize + 12) + 3 * 1024
    max_rows = max(SUB, (BUDGET // bytes_per_row) // SUB * SUB)
    tn = max(SUB, min(_round_up(int(tile_n), SUB), max_rows, _round_up(N, SUB)))

    row_tiles = -(-N // tn)
    num_blocks = 2 if row_tiles > 1 else 1               # keep both v7x TensorCores busy
    tpb = -(-row_tiles // num_blocks)
    rows_sched = num_blocks * tpb * tn
    last_block = row_tiles - 1

    # ---- inputs (no copy / pad of the big logits tensor) --------------------
    logits = predictions.reshape(N, V)                    # native dtype, leading-dim merge only

    lengths_c = jnp.minimum(jnp.asarray(lengths).astype(jnp.int32), jnp.int32(T))
    valid = jnp.arange(T, dtype=jnp.int32)[None, :] < lengths_c[:, None]      # (B, T)
    tgt = jnp.where(valid, targets.astype(jnp.int32), -1).reshape(N)
    if rows_sched != N:
        tgt = jnp.pad(tgt, (0, rows_sched - N), constant_values=-1)
    tgt = tgt.reshape(rows_sched, 1)

    # ---- index maps ----------------------------------------------------------
    if num_blocks * tpb == row_tiles:
        logits_map = lambda s, i, j: (s * tpb + i, j)
    else:
        # Odd tile count: superblock 1's overflow tile re-reads the last valid (in-bounds) block;
        # its targets are all -1 so it contributes nothing. Avoids a fully out-of-bounds DMA.
        logits_map = lambda s, i, j: (jnp.minimum(s * tpb + i, last_block), j)
    tgt_map = lambda s, i, j: (s * tpb + i, 0)
    out_map = lambda s, i, j: (s, 0, 0)

    # ---- kernel variant & VMEM sizing ----------------------------------------
    if v_tiles == 1:
        kernel = _ce_kernel_single_chunk
        scratch = []
    else:
        kernel = _make_ce_kernel_chunked(tv, V, needs_v_mask)
        scratch = [pltpu.VMEM((tn, 1), jnp.float32) for _ in range(3)]   # m, l, tgt_logit

    est_bytes = (2 * tn * tv * itemsize       # double-buffered logits blocks
                 + 3 * tn * tv * 4            # in-body f32 / int32 chunk temporaries
                 + 6 * tn * 512               # lane-padded (TN,1) targets + state columns
                 + 2 * 8 * 128 * 4)           # output block
    try:
        vmem_cap = int(getattr(pltpu.get_tpu_info(), "vmem_capacity_bytes", 64 * 1024 * 1024))
    except Exception:
        vmem_cap = 64 * 1024 * 1024           # v7x per-TensorCore size: safe lower bound
    vmem_limit = int(min(max(2 * est_bytes + (4 << 20), 32 << 20), vmem_cap - (8 << 20)))

    partial = pl.pallas_call(
        kernel,
        out_shape=jax.ShapeDtypeStruct((num_blocks, 8, 128), jnp.float32),
        grid_spec=pltpu.PrefetchScalarGridSpec(
            num_scalar_prefetch=0,
            grid=(num_blocks, tpb, v_tiles),
            in_specs=[
                pl.BlockSpec((tn, tv), logits_map),
                pl.BlockSpec((tn, 1), tgt_map),
            ],
            out_specs=pl.BlockSpec((1, 8, 128), out_map),
            scratch_shapes=scratch,
        ),
        compiler_params=pltpu.CompilerParams(
            dimension_semantics=("parallel", "arbitrary", "arbitrary"),
            vmem_limit_bytes=vmem_limit,
        ),
    )(logits, tgt)

    total = partial[:, 0, 0].sum()
    # Denominator is a pure function of (clamped) lengths -- no in-kernel count needed.
    # All-zero lengths divides by zero, matching PyTorch's behavior on an empty pack.
    denom = jnp.sum(lengths_c).astype(jnp.float32)
    return total / denom


def _reference_loss(predictions, targets, lengths):
    """Pure-JAX reference: masked-mean cross entropy (== PyTorch packed CE)."""
    B, T, V = predictions.shape
    logp = jax.nn.log_softmax(predictions.astype(jnp.float32), axis=-1)
    tok_logp = jnp.take_along_axis(logp, targets[..., None].astype(jnp.int32), axis=-1)[..., 0]
    mask = (jnp.arange(T)[None, :] < jnp.minimum(lengths, T)[:, None]).astype(jnp.float32)
    return -(tok_logp * mask).sum() / mask.sum()


if __name__ == "__main__":
    # Test 1: small f32 case (spec-sized), partial lengths, single row tile + single vocab chunk.
    key = jax.random.PRNGKey(0)
    B, T, V = 2, 8, 32
    k1, k2 = jax.random.split(key)
    predictions = jax.random.normal(k1, (B, T, V), dtype=jnp.float32)
    targets = jax.random.randint(k2, (B, T), 0, V, dtype=jnp.int32)
    lengths = jnp.array([8, 5], dtype=jnp.int32)  # sorted descending, as pack_padded_sequence expects
    loss = jax.block_until_ready(
        jax.jit(packed_cross_entropy_loss)(predictions, targets, lengths))
    ref = _reference_loss(predictions, targets, lengths)
    assert jnp.allclose(loss, ref, atol=1e-5, rtol=1e-5), (loss, ref)

    # Test 2: bf16 logits (native-dtype path) with a ragged last row tile (N = 33).
    k1, k2 = jax.random.split(jax.random.PRNGKey(2))
    B, T, V = 3, 11, 256
    p2 = jax.random.normal(k1, (B, T, V), dtype=jnp.float32).astype(jnp.bfloat16)
    t2 = jax.random.randint(k2, (B, T), 0, V, dtype=jnp.int32)
    l2 = jnp.array([11, 9, 4], dtype=jnp.int32)
    loss2 = jax.block_until_ready(jax.jit(packed_cross_entropy_loss)(p2, t2, l2))
    ref2 = _reference_loss(p2, t2, l2)
    assert jnp.allclose(loss2, ref2, atol=1e-3, rtol=1e-3), (loss2, ref2)

    # Test 3: even multi-tile grid exercising the 2-way parallel superblock axis.
    k1, k2 = jax.random.split(jax.random.PRNGKey(1))
    B, T, V = 4, 64, 128
    p3 = jax.random.normal(k1, (B, T, V), dtype=jnp.float32)
    t3 = jax.random.randint(k2, (B, T), 0, V, dtype=jnp.int32)
    l3 = jnp.array([64, 50, 33, 7], dtype=jnp.int32)
    loss3 = jax.block_until_ready(
        jax.jit(functools.partial(packed_cross_entropy_loss, tile_n=128))(p3, t3, l3))
    ref3 = _reference_loss(p3, t3, l3)
    assert jnp.allclose(loss3, ref3, atol=1e-5, rtol=1e-5), (loss3, ref3)

    # Test 4: V-chunked online-logsumexp path with a ragged last vocab block (V=300, tile_v=128).
    k1, k2 = jax.random.split(jax.random.PRNGKey(3))
    B, T, V = 2, 16, 300
    p4 = jax.random.normal(k1, (B, T, V), dtype=jnp.float32)
    t4 = jax.random.randint(k2, (B, T), 0, V, dtype=jnp.int32)
    l4 = jnp.array([16, 9], dtype=jnp.int32)
    loss4 = jax.block_until_ready(
        jax.jit(functools.partial(packed_cross_entropy_loss, tile_v=128))(p4, t4, l4))
    ref4 = _reference_loss(p4, t4, l4)
    assert jnp.allclose(loss4, ref4, atol=1e-4, rtol=1e-4), (loss4, ref4)

    # Test 5: odd row-tile count -> clamped duplicate tile keeps both superblocks populated.
    k1, k2 = jax.random.split(jax.random.PRNGKey(4))
    B, T, V = 4, 96, 128
    p5 = jax.random.normal(k1, (B, T, V), dtype=jnp.float32)
    t5 = jax.random.randint(k2, (B, T), 0, V, dtype=jnp.int32)
    l5 = jnp.array([96, 70, 40, 5], dtype=jnp.int32)
    loss5 = jax.block_until_ready(
        jax.jit(functools.partial(packed_cross_entropy_loss, tile_n=128))(p5, t5, l5))
    ref5 = _reference_loss(p5, t5, l5)
    assert jnp.allclose(loss5, ref5, atol=1e-5, rtol=1e-5), (loss5, ref5)

    print("KERNEL_OK")
</pallas_src>

<mosaic_0001>
module attributes {stable_mosaic.version = 11 : i64} {
  func.func @_ce_kernel_single_chunk(%arg0: i32, %arg1: i32, %arg2: i32, %arg3: memref<16x32xf32, #tpu.memory_space<vmem>>, %arg4: memref<16x1xi32, #tpu.memory_space<vmem>>, %arg5: memref<1x8x128xf32, #tpu.memory_space<vmem>>) attributes {dimension_semantics = [#tpu.dimension_semantics<parallel>, #tpu.dimension_semantics<arbitrary>, #tpu.dimension_semantics<arbitrary>], iteration_bounds = array<i64: 1, 1, 1>, scalar_prefetch = 0 : i64, scratch_operands = 0 : i64, tpu.core_type = #tpu.core_type<tc>, window_params = [{transform_indices = @transform_0, window_bounds = array<i64: 16, 32>}, {transform_indices = @transform_1, window_bounds = array<i64: 16, 1>}, {transform_indices = @transform_2, window_bounds = array<i64: 1, 8, 128>}]} {
    %c0_i32 = arith.constant 0 : i32
    %0 = arith.cmpi eq, %arg1, %c0_i32 : i32
    %1 = arith.extui %0 : i1 to i32
    %c0_i32_0 = arith.constant 0 : i32
    %2 = arith.cmpi ne, %1, %c0_i32_0 : i32
    scf.if %2 {
      %cst_16 = arith.constant 0.000000e+00 : f32
      %34 = vector.broadcast %cst_16 : f32 to vector<1x8x128xf32>
      %c0_17 = arith.constant 0 : index
      %c0_18 = arith.constant 0 : index
      %c0_19 = arith.constant 0 : index
      %35 = vector.load %arg5[%c0_17, %c0_18, %c0_19] : memref<1x8x128xf32, #tpu.memory_space<vmem>>, vector<1x8x128xf32>
      tpu.vector_store %arg5[%c0_17, %c0_18, %c0_19], %34 {strides = array<i32>} : memref<1x8x128xf32, #tpu.memory_space<vmem>>, vector<1x8x128xf32>,
    } else {
    }
    %c0 = arith.constant 0 : index
    %c0_1 = arith.constant 0 : index
    %3 = vector.load %arg3[%c0, %c0_1] : memref<16x32xf32, #tpu.memory_space<vmem>>, vector<16x32xf32>
    %c0_2 = arith.constant 0 : index
    %c0_3 = arith.constant 0 : index
    %4 = vector.load %arg4[%c0_2, %c0_3] : memref<16x1xi32, #tpu.memory_space<vmem>>, vector<16x1xi32>
    %5 = tpu.iota {dimensions = array<i32: 1>} : vector<16x32xi32>
    %6 = vector.broadcast %4 : vector<16x1xi32> to vector<16x32xi32>
    %7 = arith.cmpi eq, %5, %6 : vector<16x32xi32>
    %cst = arith.constant 0.000000e+00 : f32
    %8 = vector.broadcast %cst : f32 to vector<16x32xf32>
    %9 = arith.select %7, %3, %8 : vector<16x32xi1>, vector<16x32xf32>
    %cst_4 = arith.constant dense<0.000000e+00> : vector<16xf32>
    %10 = vector.multi_reduction <add>, %9, %cst_4 [1] : vector<16x32xf32> to vector<16xf32>
    %11 = vector.shape_cast %10 : vector<16xf32> to vector<16x1xf32>
    %cst_5 = arith.constant dense<0xFF800000> : vector<16xf32>
    %12 = vector.multi_reduction <maximumf>, %3, %cst_5 [1] : vector<16x32xf32> to vector<16xf32>
    %13 = vector.shape_cast %12 : vector<16xf32> to vector<16x1xf32>
    %14 = vector.broadcast %13 : vector<16x1xf32> to vector<16x32xf32>
    %15 = arith.subf %3, %14 : vector<16x32xf32>
    %16 = math.exp %15 : vector<16x32xf32>
    %cst_6 = arith.constant dense<0.000000e+00> : vector<16xf32>
    %17 = vector.multi_reduction <add>, %16, %cst_6 [1] : vector<16x32xf32> to vector<16xf32>
    %18 = vector.shape_cast %17 : vector<16xf32> to vector<16x1xf32>
    %19 = math.log %18 : vector<16x1xf32>
    %20 = arith.addf %13, %19 : vector<16x1xf32>
    %c0_i32_7 = arith.constant 0 : i32
    %21 = vector.broadcast %c0_i32_7 : i32 to vector<16x1xi32>
    %22 = arith.cmpi sge, %4, %21 : vector<16x1xi32>
    %23 = arith.subf %20, %11 : vector<16x1xf32>
    %cst_8 = arith.constant 0.000000e+00 : f32
    %24 = vector.broadcast %cst_8 : f32 to vector<16x1xf32>
    %25 = arith.select %22, %23, %24 : vector<16x1xi1>, vector<16x1xf32>
    %c0_9 = arith.constant 0 : index
    %c0_10 = arith.constant 0 : index
    %c0_11 = arith.constant 0 : index
    %26 = vector.load %arg5[%c0_9, %c0_10, %c0_11] : memref<1x8x128xf32, #tpu.memory_space<vmem>>, vector<1x8x128xf32>
    %27 = vector.shape_cast %25 : vector<16x1xf32> to vector<1x16x1xf32>
    %cst_12 = arith.constant dense<0.000000e+00> : vector<1xf32>
    %28 = vector.multi_reduction <add>, %27, %cst_12 [1, 2] : vector<1x16x1xf32> to vector<1xf32>
    %29 = vector.shape_cast %28 : vector<1xf32> to vector<1x1x1xf32>
    %30 = vector.extract %29[0, 0, 0] : f32 from vector<1x1x1xf32>
    %31 = vector.broadcast %30 : f32 to vector<1x8x128xf32>
    %32 = arith.addf %26, %31 : vector<1x8x128xf32>
    %c0_13 = arith.constant 0 : index
    %c0_14 = arith.constant 0 : index
    %c0_15 = arith.constant 0 : index
    %33 = vector.load %arg5[%c0_13, %c0_14, %c0_15] : memref<1x8x128xf32, #tpu.memory_space<vmem>>, vector<1x8x128xf32>
    tpu.vector_store %arg5[%c0_13, %c0_14, %c0_15], %32 {strides = array<i32>} : memref<1x8x128xf32, #tpu.memory_space<vmem>>, vector<1x8x128xf32>,
    return
  }
  func.func @transform_0(%arg0: i32, %arg1: i32, %arg2: i32) -> (i32, i32) {
    %c1_i32 = arith.constant 1 : i32
    %0 = arith.muli %arg0, %c1_i32 : i32
    %1 = arith.addi %0, %arg1 : i32
    %c0_i32 = arith.constant 0 : i32
    return %1, %arg2 : i32, i32
  }
  func.func @transform_1(%arg0: i32, %arg1: i32, %arg2: i32) -> (i32, i32) {
    %c1_i32 = arith.constant 1 : i32
    %0 = arith.muli %arg0, %c1_i32 : i32
    %1 = arith.addi %0, %arg1 : i32
    %c0_i32 = arith.constant 0 : i32
    %c0_i32_0 = arith.constant 0 : i32
    return %1, %c0_i32 : i32, i32
  }
  func.func @transform_2(%arg0: i32, %arg1: i32, %arg2: i32) -> (i32, i32, i32) {
    %c0_i32 = arith.constant 0 : i32
    %c0_i32_0 = arith.constant 0 : i32
    %c0_i32_1 = arith.constant 0 : i32
    return %arg0, %c0_i32, %c0_i32_0 : i32, i32, i32
  }
}

</mosaic_0001>

<bundles_post_ra>
// kernel: packed_cross_entropy_loss.1
= control target key start
LH: loop header
LB: loop body
LE: loop exit
PB: predicated region body
PF: predicated region fallthrough
CT: control target
= control target key end

     0   :  { %vm76_vm0 = vcmask 261120   ;;  %v160_v1 = vmov 0   ;;  %v64_v7 = vlaneseq  ;;  %vm114_vm5 = vcmask 7168   ;;  %s197_s0 = inlined_call_operand.vmem [shape: f32[16,32], index: 0, kind: input, shape index: {}]   ;;  %s198_s1 = inlined_call_operand.vmem [shape: s32[16,1], index: 1, kind: input, shape index: {}]   ;;  %s199_s2 = inlined_call_operand.vmem [shape: f32[1,8,128], index: 2, kind: output, shape index: {}]  }
   0x1   :  { %v60_v0 = vld [vmem:[%s197_s0] sm:$0xff]  ;;  %150 = vset.pattern.permute.xlu1 %v160_v1  ;;  %151 = vset.pattern.permute.xlu0 %v160_v1  ;;  %v61_v4 = vld [vmem:[%s197_s0 + $0x8] sm:$0xff] }
   0x2   :  { %v62_v2 = vld [vmem:[%s198_s1] sm:$0xff]  ;;  %v83_v3 = vsel %vm76_vm0, %v60_v0, -inf  ;;  %v63_v5 = vld [vmem:[%s198_s1 + $0x8] sm:$0xff]  ;;  %v86_v6 = vsel %vm76_vm0, %v61_v4, -inf  ;;  %v65_v8 = vand.u32 127, %v64_v7 }
   0x3   :  { %67 = vperm.xlu1 %150, %v62_v2   ;;  %84 = vmax.xlane.f32.xlu0 %v83_v3  ;;  %vm107_vm3 = vcmp.ge.s32.totalorder %v62_v2, 0  ;;  %vm108_vm4 = vcmp.ge.s32.totalorder %v63_v5, 0 }
   0xb   :  { %70 = vperm.xlu1 %150, %v63_v5   ;;  %87 = vmax.xlane.f32.xlu0 %v86_v6 }
  0x75   :  { %v68_v9 = vpop.permute.xlu1 %67 }
  0x76   :  { %vm72_vm1 = vcmp.eq.s32.totalorder %v65_v8, %v68_v9  ;;  %v85_v10 = vpop.xlane.xlu0 %84 }
  0x77   :  { %v74_v11 = vsel %vm72_vm1, %v60_v0, 0.0  ;;  %v89_v12 = vsub.f32 %v60_v0, %v85_v10 }
  0x78   :  { %v77_v13 = vsel %vm76_vm0, %v74_v11, 0.0 }
  0x79   :  { %78 = vadd.xlane.f32.xlu0 %v77_v13  ;;  %v91_v14 = vmul.f32 1.442695, %v89_v12 }
  0x7b   :  { %152 = vpow2.f32 %v91_v14 }
  0x7d   :  { %v71_v15 = vpop.permute.xlu1 %70 }
  0x7e   :  { %vm73_vm2 = vcmp.eq.s32.totalorder %v65_v8, %v71_v15  ;;  %v88_v16 = vpop.xlane.xlu0 %87 }
  0x7f   :  { %v75_v17 = vsel %vm73_vm2, %v61_v4, 0.0  ;;  %v90_v18 = vsub.f32 %v61_v4, %v88_v16 }
  0x80   :  { %v80_v19 = vsel %vm76_vm0, %v75_v17, 0.0 }
  0x81   :  { %81 = vadd.xlane.f32.xlu1 %v80_v19  ;;  %v153_v20 = vpop.eup %152  ;;  %v93_v21 = vmul.f32 1.442695, %v90_v18 }
  0x82   :  { %v95_v22 = vsel %vm76_vm0, %v153_v20, 0.0 }
  0x83   :  { %154 = vpow2.f32 %v93_v21  ;;  %96 = vadd.xlane.f32.xlu2 %v95_v22 }
  0x89   :  { %v155_v23 = vpop.eup %154 }
  0x8a   :  { %v98_v24 = vsel %vm76_vm0, %v155_v23, 0.0 }
  0x8b   :  { %99 = vadd.xlane.f32.xlu2 %v98_v24 }
  0xec   :  { %v79_v30 = vpop.xlane.xlu0 %78 }
  0xf4   :  { %v82_v35 = vpop.xlane.xlu1 %81 }
  0xf6   :  { %v97_v25 = vpop.xlane.xlu2 %96 }
  0xf7   :  { %156 = vlog2.f32 %v97_v25 }
  0xfd   :  { %v157_v26 = vpop.eup %156 }
  0xfe   :  { %v102_v27 = vmul.f32 0.6931472, %v157_v26  ;;  %v100_v28 = vpop.xlane.xlu2 %99 }
  0xff   :  { %158 = vlog2.f32 %v100_v28 }
 0x100   :  { %v105_v29 = vadd.f32 %v102_v27, %v85_v10 }
 0x102   :  { %v109_v33 = vsub.f32 %v105_v29, %v79_v30 }
 0x104   :  { %v111_v37 = vsel %vm107_vm3, %v109_v33, 0.0 }
 0x105   :  { %v159_v31 = vpop.eup %158  ;;  %v115_v39 = vsel %vm114_vm5, %v111_v37, 0.0 }
 0x106   :  { %v104_v32 = vmul.f32 0.6931472, %v159_v31 }
 0x108   :  { %v106_v34 = vadd.f32 %v104_v32, %v88_v16 }
 0x10a   :  { %v110_v36 = vsub.f32 %v106_v34, %v82_v35 }
 0x10c   :  { %v112_v38 = vsel %vm108_vm4, %v110_v36, 0.0 }
 0x10d   :  { %v116_v40 = vsel %vm114_vm5, %v112_v38, 0.0 }
 0x10e   :  { %v117_v41 = vadd.f32 %v116_v40, %v115_v39 }
 0x110   :  { %118 = vadd.xlane.f32.xlu2 %v117_v41 }
 0x183   :  { %v119_v42 = vpop.xlane.xlu2 %118 }
 0x184   :  { %v120_v43 = vrot.slane %v119_v42, 4 }
 0x186   :  { %v121_v44 = vadd.f32 %v120_v43, %v119_v42 }
 0x188   :  { %v122_v45 = vrot.slane %v121_v44, 2 }
 0x18a   :  { %v123_v46 = vadd.f32 %v122_v45, %v121_v44 }
 0x18c   :  { %v124_v47 = vrot.slane %v123_v46, 1 }
 0x18e   :  { %v125_v48 = vadd.f32 %v124_v47, %v123_v46 }
 0x190   :  { %146 = vpush %v125_v48 }
 0x1c1   :  { %s147_s0 = spop %146 }
 0x1c2   :  { %v127_v49 = vstv %s147_s0 }
 0x1c3   :  { %129 = vst [vmem:[%s199_s2] sm:$0xff] %v127_v49 }

</bundles_post_ra>
